<compile_context>
chip_gen: v7x
topology: tpu7x:2x2x1
jax: 0.10.0
libtpu: 0.0.40
codegen_flags: <defaults>
</compile_context>

<pallas_src>
import functools
import math

import jax
import jax.numpy as jnp
from jax.experimental import pallas as pl
from jax.experimental.pallas import tpu as pltpu


def positional_encodings_kernel(idx_ref, w_ref, out_ref, *,
                                max_relative_feature, groups):
    """One row-tile of the relative-position embedding.

    idx_ref : [2, tr, G] int32  (plane 0 = offsets, plane 1 = masks)
    w_ref   : [C_pad, num_emb] f32  fused (W^T + bias), zero-padded rows
    out_ref : [tr, G*num_emb]       lane-dense output slab
    """
    tr = idx_ref.shape[1]
    c_pad = w_ref.shape[0]
    two_mr = 2 * max_relative_feature

    off = idx_ref[0]                      # [tr, G] int32
    m = idx_ref[1]                        # [tr, G] int32

    # d = clip(offset + max_rel, 0, 2*max_rel) * mask + (1 - mask) * (2*max_rel + 1)
    d = jnp.clip(off + max_relative_feature, 0, two_mr) * m + (1 - m) * (two_mr + 1)

    col = jax.lax.broadcasted_iota(jnp.int32, (tr, c_pad), 1)
    w = w_ref[...]                        # [C_pad, num_emb] f32 (resident)

    parts = []
    for g in range(groups):
        d_g = d[:, g:g + 1]                           # [tr, 1]
        onehot_g = (col == d_g).astype(jnp.float32)   # [tr, C_pad], in-register
        # Exact row select (+ folded bias): [tr, C_pad] @ [C_pad, num_emb]
        parts.append(jnp.dot(onehot_g, w, preferred_element_type=jnp.float32))
    e = parts[0] if groups == 1 else jnp.concatenate(parts, axis=-1)
    out_ref[...] = e.astype(out_ref.dtype)            # one dense [tr, 128] store


def positional_encodings_forward(offset, mask, weight, bias, *,
                                 max_relative_feature=32, tile_elems=8192):
    """Pallas forward for PositionalEncodings.

    offset, mask : integer arrays of identical shape [...]
    weight       : torch-layout Linear weight [num_embeddings, 2*max_rel + 2]
    bias         : [num_embeddings]
    returns      : [..., num_embeddings] float32
    """
    num_emb = weight.shape[0]
    in_features = 2 * max_relative_feature + 2
    assert weight.shape == (num_emb, in_features)

    orig_shape = tuple(offset.shape)
    M = math.prod(orig_shape) if orig_shape else 1

    # Pack G elements per output row so the HBM-facing output slab is lane-dense
    # (G*num_emb == 128 for num_emb == 32).
    G = max(1, 128 // num_emb)
    out_w = G * num_emb

    # Tile sizing: tr (output rows per step) must be a multiple of 8 sublanes,
    # i.e. elements-per-step a multiple of 8*G.  Clamp for tiny inputs.
    chunk = 8 * G
    tile = min(tile_elems, pl.cdiv(M, chunk) * chunk)
    tile = pl.cdiv(tile, chunk) * chunk
    m_pad = pl.cdiv(M, tile) * tile
    R = m_pad // G
    tr = tile // G
    n_tiles = m_pad // tile

    off_flat = offset.reshape(-1).astype(jnp.int32)
    mask_flat = mask.reshape(-1).astype(jnp.int32)
    if m_pad != M:
        pad = m_pad - M
        # Padded elements (offset=0, mask=0) select the "no relation" class,
        # produce finite values and are sliced off below.
        off_flat = jnp.pad(off_flat, (0, pad))
        mask_flat = jnp.pad(mask_flat, (0, pad))

    # Single stacked index input: [2, R, G] (plane 0 = offsets, plane 1 = masks).
    idx = jnp.stack([off_flat.reshape(R, G), mask_flat.reshape(R, G)], axis=0)

    # Fused weight: transpose to [in, out], fold the bias in (exact, since each
    # one-hot row sums to 1), zero-pad the one-hot axis to a 128-lane multiple.
    c_pad = pl.cdiv(in_features, 128) * 128
    w_fused = jnp.zeros((c_pad, num_emb), jnp.float32)
    w_fused = w_fused.at[:in_features, :].set(
        weight.astype(jnp.float32).T + bias.astype(jnp.float32)[None, :])

    kernel = functools.partial(positional_encodings_kernel,
                               max_relative_feature=max_relative_feature,
                               groups=G)

    out = pl.pallas_call(
        kernel,
        out_shape=jax.ShapeDtypeStruct((R, out_w), jnp.float32),
        grid=(n_tiles,),
        in_specs=[
            pl.BlockSpec((2, tr, G), lambda i: (0, i, 0)),       # stacked indices
            pl.BlockSpec((c_pad, num_emb), lambda i: (0, 0)),    # fused W (resident)
        ],
        out_specs=pl.BlockSpec((tr, out_w), lambda i: (i, 0)),   # lane-dense slab
        compiler_params=pltpu.CompilerParams(
            dimension_semantics=("parallel",),
            vmem_limit_bytes=32 * 1024 * 1024),
    )(idx, w_fused)

    return out.reshape(m_pad, num_emb)[:M].reshape(*orig_shape, num_emb)


if __name__ == "__main__":
    # Small shapes consistent with the module's usage:
    # batch=2, nodes=8, neighbors=4, num_embeddings=32, max_relative_feature=32.
    B, N, K = 2, 8, 4
    num_embeddings = 32
    max_rel = 32

    key = jax.random.PRNGKey(0)
    k_off, k_mask, k_w, k_b = jax.random.split(key, 4)

    offset = jax.random.randint(k_off, (B, N, K), -64, 64, dtype=jnp.int32)
    mask = (jax.random.uniform(k_mask, (B, N, K)) > 0.2).astype(jnp.int32)
    weight = jax.random.normal(k_w, (num_embeddings, 2 * max_rel + 2),
                               jnp.float32) * 0.1
    bias = jax.random.normal(k_b, (num_embeddings,), jnp.float32) * 0.01

    E = positional_encodings_forward(offset, mask, weight, bias,
                                     max_relative_feature=max_rel)
    jax.block_until_ready(E)
    assert E.shape == (B, N, K, num_embeddings)

    # Pure-JAX reference (mirrors the torch forward exactly).
    d_ref = (jnp.clip(offset + max_rel, 0, 2 * max_rel) * mask
             + (1 - mask) * (2 * max_rel + 1))
    onehot_ref = jax.nn.one_hot(d_ref, 2 * max_rel + 2, dtype=jnp.float32)
    E_ref = onehot_ref @ weight.T + bias
    assert jnp.allclose(E, E_ref, atol=1e-5, rtol=1e-5)

    print("KERNEL_OK")
</pallas_src>

<mosaic_0001>
module attributes {stable_mosaic.version = 11 : i64} {
  func.func @positional_encodings_kernel(%arg0: i32, %arg1: memref<2x16x4xi32, #tpu.memory_space<vmem>>, %arg2: memref<128x32xf32, #tpu.memory_space<vmem>>, %arg3: memref<16x128xf32, #tpu.memory_space<vmem>>) attributes {dimension_semantics = [#tpu.dimension_semantics<parallel>], iteration_bounds = array<i64: 1>, scalar_prefetch = 0 : i64, scratch_operands = 0 : i64, tpu.core_type = #tpu.core_type<tc>, window_params = [{transform_indices = @transform_0, window_bounds = array<i64: 2, 16, 4>}, {pipeline_mode = #tpu.pipeline_mode<synchronous>, transform_indices = @transform_1, window_bounds = array<i64: 128, 32>}, {transform_indices = @transform_2, window_bounds = array<i64: 16, 128>}]} {
    %c0 = arith.constant 0 : index
    %c0_0 = arith.constant 0 : index
    %c0_1 = arith.constant 0 : index
    %0 = vector.load %arg1[%c0, %c0_0, %c0_1] : memref<2x16x4xi32, #tpu.memory_space<vmem>>, vector<1x16x4xi32>
    %1 = vector.shape_cast %0 : vector<1x16x4xi32> to vector<16x4xi32>
    %c1 = arith.constant 1 : index
    %c0_2 = arith.constant 0 : index
    %c0_3 = arith.constant 0 : index
    %2 = vector.load %arg1[%c1, %c0_2, %c0_3] : memref<2x16x4xi32, #tpu.memory_space<vmem>>, vector<1x16x4xi32>
    %3 = vector.shape_cast %2 : vector<1x16x4xi32> to vector<16x4xi32>
    %c32_i32 = arith.constant 32 : i32
    %4 = vector.broadcast %c32_i32 : i32 to vector<16x4xi32>
    %5 = arith.addi %1, %4 : vector<16x4xi32>
    %c0_i32 = arith.constant 0 : i32
    %c64_i32 = arith.constant 64 : i32
    %6 = vector.broadcast %c0_i32 : i32 to vector<16x4xi32>
    %7 = arith.maxsi %6, %5 : vector<16x4xi32>
    %8 = vector.broadcast %c64_i32 : i32 to vector<16x4xi32>
    %9 = arith.minsi %8, %7 : vector<16x4xi32>
    %10 = arith.muli %9, %3 : vector<16x4xi32>
    %c1_i32 = arith.constant 1 : i32
    %11 = vector.broadcast %c1_i32 : i32 to vector<16x4xi32>
    %12 = arith.subi %11, %3 : vector<16x4xi32>
    %c65_i32 = arith.constant 65 : i32
    %13 = vector.broadcast %c65_i32 : i32 to vector<16x4xi32>
    %14 = arith.muli %12, %13 : vector<16x4xi32>
    %15 = arith.addi %10, %14 : vector<16x4xi32>
    %16 = tpu.iota {dimensions = array<i32: 1>} : vector<16x128xi32>
    %c0_4 = arith.constant 0 : index
    %c0_5 = arith.constant 0 : index
    %17 = vector.load %arg2[%c0_4, %c0_5] : memref<128x32xf32, #tpu.memory_space<vmem>>, vector<128x32xf32>
    %18 = vector.extract_strided_slice %15 {offsets = [0, 0], sizes = [16, 1], strides = [1, 1]} : vector<16x4xi32> to vector<16x1xi32>
    %19 = vector.broadcast %18 : vector<16x1xi32> to vector<16x128xi32>
    %20 = arith.cmpi eq, %16, %19 : vector<16x128xi32>
    %21 = arith.extui %20 : vector<16x128xi1> to vector<16x128xi32>
    %22 = arith.sitofp %21 : vector<16x128xi32> to vector<16x128xf32>
    %cst = arith.constant dense<0.000000e+00> : vector<16x32xf32>
    %23 = tpu.matmul %22, %17, %cst {dimension_numbers = #tpu.dot_dimension_numbers<[1], [0], [0], [1], [0, 0, 1, 1], [], []>} : vector<16x128xf32>, vector<128x32xf32>, vector<16x32xf32> -> vector<16x32xf32>
    %24 = vector.extract_strided_slice %15 {offsets = [0, 1], sizes = [16, 1], strides = [1, 1]} : vector<16x4xi32> to vector<16x1xi32>
    %25 = vector.broadcast %24 : vector<16x1xi32> to vector<16x128xi32>
    %26 = arith.cmpi eq, %16, %25 : vector<16x128xi32>
    %27 = arith.extui %26 : vector<16x128xi1> to vector<16x128xi32>
    %28 = arith.sitofp %27 : vector<16x128xi32> to vector<16x128xf32>
    %cst_6 = arith.constant dense<0.000000e+00> : vector<16x32xf32>
    %29 = tpu.matmul %28, %17, %cst_6 {dimension_numbers = #tpu.dot_dimension_numbers<[1], [0], [0], [1], [0, 0, 1, 1], [], []>} : vector<16x128xf32>, vector<128x32xf32>, vector<16x32xf32> -> vector<16x32xf32>
    %30 = vector.extract_strided_slice %15 {offsets = [0, 2], sizes = [16, 1], strides = [1, 1]} : vector<16x4xi32> to vector<16x1xi32>
    %31 = vector.broadcast %30 : vector<16x1xi32> to vector<16x128xi32>
    %32 = arith.cmpi eq, %16, %31 : vector<16x128xi32>
    %33 = arith.extui %32 : vector<16x128xi1> to vector<16x128xi32>
    %34 = arith.sitofp %33 : vector<16x128xi32> to vector<16x128xf32>
    %cst_7 = arith.constant dense<0.000000e+00> : vector<16x32xf32>
    %35 = tpu.matmul %34, %17, %cst_7 {dimension_numbers = #tpu.dot_dimension_numbers<[1], [0], [0], [1], [0, 0, 1, 1], [], []>} : vector<16x128xf32>, vector<128x32xf32>, vector<16x32xf32> -> vector<16x32xf32>
    %36 = vector.extract_strided_slice %15 {offsets = [0, 3], sizes = [16, 1], strides = [1, 1]} : vector<16x4xi32> to vector<16x1xi32>
    %37 = vector.broadcast %36 : vector<16x1xi32> to vector<16x128xi32>
    %38 = arith.cmpi eq, %16, %37 : vector<16x128xi32>
    %39 = arith.extui %38 : vector<16x128xi1> to vector<16x128xi32>
    %40 = arith.sitofp %39 : vector<16x128xi32> to vector<16x128xf32>
    %cst_8 = arith.constant dense<0.000000e+00> : vector<16x32xf32>
    %41 = tpu.matmul %40, %17, %cst_8 {dimension_numbers = #tpu.dot_dimension_numbers<[1], [0], [0], [1], [0, 0, 1, 1], [], []>} : vector<16x128xf32>, vector<128x32xf32>, vector<16x32xf32> -> vector<16x32xf32>
    %42 = tpu.concatenate %23, %29, %35, %41 in 1 : vector<16x32xf32>, vector<16x32xf32>, vector<16x32xf32>, vector<16x32xf32> -> vector<16x128xf32>
    %c0_9 = arith.constant 0 : index
    %c0_10 = arith.constant 0 : index
    %43 = vector.load %arg3[%c0_9, %c0_10] : memref<16x128xf32, #tpu.memory_space<vmem>>, vector<16x128xf32>
    tpu.vector_store %arg3[%c0_9, %c0_10], %42 {strides = array<i32>} : memref<16x128xf32, #tpu.memory_space<vmem>>, vector<16x128xf32>,
    return
  }
  func.func @transform_0(%arg0: i32) -> (i32, i32, i32) {
    %c0_i32 = arith.constant 0 : i32
    %c0_i32_0 = arith.constant 0 : i32
    %c0_i32_1 = arith.constant 0 : i32
    return %c0_i32, %arg0, %c0_i32_0 : i32, i32, i32
  }
  func.func @transform_1(%arg0: i32) -> (i32, i32) {
    %c0_i32 = arith.constant 0 : i32
    %c0_i32_0 = arith.constant 0 : i32
    %c0_i32_1 = arith.constant 0 : i32
    return %c0_i32, %c0_i32_0 : i32, i32
  }
  func.func @transform_2(%arg0: i32) -> (i32, i32) {
    %c0_i32 = arith.constant 0 : i32
    %c0_i32_0 = arith.constant 0 : i32
    return %arg0, %c0_i32 : i32, i32
  }
}

</mosaic_0001>

<bundles_post_ra>
// kernel: tpu_custom_call.1
= control target key start
LH: loop header
LB: loop body
LE: loop exit
PB: predicated region body
PF: predicated region fallthrough
CT: control target
= control target key end

     0   :  { %v851_v3 = vmov 1   ;;  %v852_v4 = vmov 0   ;;  %s1019_s0 = inlined_call_operand.vmem [shape: s32[2,16,4], index: 0, kind: input, shape index: {}]   ;;  %s1020_s1 = inlined_call_operand.vmem [shape: f32[128,32], index: 1, kind: input, shape index: {}]   ;;  %s1021_s2 = inlined_call_operand.hbm [shape: f32[16,128], index: 2, kind: output, shape index: {}]  }
   0x1   :  { %v12_v0 = vld [vmem:[%s1019_s0] sm:$0xff]  ;;  %v452_v1 = vld [vmem:[%s1019_s0 + $0x10] sm:$0xff]  ;;  %v13_v2 = vld [vmem:[%s1019_s0 + $0x8] sm:$0xff]  ;;  %822 = vset.pattern.permute.xlu1 %v851_v3  ;;  %821 = vset.pattern.permute.xlu0 %v852_v4 }
   0x2   :  { %v17_v5 = vadd.s32 32, %v12_v0  ;;  %v29_v6 = vsub.s32 1, %v452_v1  ;;  %v453_v7 = vld [vmem:[%s1019_s0 + $0x18] sm:$0xff]  ;;  %v18_v8 = vadd.s32 32, %v13_v2  ;;  %v37_v9 = vld [vmem:[%s1020_s1] sm:$0xff]  ;;  %v38_v11 = vld [vmem:[%s1020_s1 + $0x8] sm:$0xff] }
   0x3   :  { %v30_v10 = vsub.s32 1, %v453_v7  ;;  %v39_v12 = vld [vmem:[%s1020_s1 + $0x10] sm:$0xff]  ;;  %v40_v13 = vld [vmem:[%s1020_s1 + $0x18] sm:$0xff]  ;;  %v901_v14 = vpack.c.bf16 %v38_v11, %v37_v9  ;;  %v41_v19 = vld [vmem:[%s1020_s1 + $0x20] sm:$0xff] }
   0x4   :  { %vm19_vm0 = vcmp.gt.s32.totalorder %v17_v5, 0  ;;  %vm21_vm1 = vcmp.gt.s32.totalorder %v18_v8, 0  ;;  %v903_v17 = vpack.c.bf16 %v40_v13, %v39_v12  ;;  %v31_v18 = vmul.u32 65, %v29_v6  ;;  %v42_v20 = vld [vmem:[%s1020_s1 + $0x28] sm:$0xff] }
   0x5   :  { %v20_v15 = vsel %vm19_vm0, %v17_v5, 0  ;;  %v22_v16 = vsel %vm21_vm1, %v18_v8, 0  ;;  %683 = vmatprep.subr.bf16.mxu0 %v901_v14  ;;  %715 = vmatprep.subr.bf16.mxu1 %v901_v14  ;;  %v32_v23 = vmul.u32 65, %v30_v10 }
   0x6   :  { %vm23_vm2 = vcmp.lt.s32.totalorder %v20_v15, 64  ;;  %vm25_vm3 = vcmp.lt.s32.totalorder %v22_v16, 64  ;;  %685 = vmatpush3.bf16.msra.mxu0 %v901_v14  ;;  %717 = vmatpush3.bf16.msra.mxu1 %v901_v14 }
   0x7   :  { %v24_v21 = vsel %vm23_vm2, %v20_v15, 64  ;;  %v26_v22 = vsel %vm25_vm3, %v22_v16, 64 }
   0x8   :  { %7 = vsyncpa [#allocation3], 0  ;;  %v27_v24 = vmul.u32 %v452_v1, %v24_v21  ;;  %v28_v25 = vmul.u32 %v453_v7, %v26_v22  ;;  %687 = vmatprep.subr.bf16.mxu0 %v903_v17  ;;  %719 = vmatprep.subr.bf16.mxu1 %v903_v17  ;;  %v917_v26 = vpack.c.bf16 %v42_v20, %v41_v19  ;;  %v43_v28 = vld [vmem:[%s1020_s1 + $0x30] sm:$0xff]  ;;  %v44_v29 = vld [vmem:[%s1020_s1 + $0x38] sm:$0xff]  ;;  %v853_v37 = vmov 2   ;;  %s857_s20 = smov 64  }
   0x9   :  { %v929_v31 = vpack.c.bf16 %v44_v29, %v43_v28  ;;  %v45_v32 = vld [vmem:[%s1020_s1 + $0x40] sm:$0xff]  ;;  %v46_v33 = vld [vmem:[%s1020_s1 + $0x48] sm:$0xff]  ;;  %v47_v34 = vld [vmem:[%s1020_s1 + $0x50] sm:$0xff]  ;;  %v854_v42 = vmov 3   ;;  %v35_v46 = vlaneseq  ;;  %v855_v50 = vmov 1.0   ;;  %s858_s21 = smov 96  }
   0xa   :  { %v33_v27 = vadd.s32 %v31_v18, %v27_v24  ;;  %689 = vmatpush3.bf16.msra.mxu0 %v903_v17  ;;  %721 = vmatpush3.bf16.msra.mxu1 %v903_v17  ;;  %v34_v30 = vadd.s32 %v32_v23, %v28_v25  ;;  %v48_v35 = vld [vmem:[%s1020_s1 + $0x58] sm:$0xff]  ;;  %v947_v36 = vpack.c.bf16 %v46_v33, %v45_v32  ;;  %v49_v39 = vld [vmem:[%s1020_s1 + $0x60] sm:$0xff]  ;;  %v50_v40 = vld [vmem:[%s1020_s1 + $0x68] sm:$0xff]  ;;  %vm425_vm12 = vcmask 261120   ;;  %s859_s22 = smov [#allocation2]  }
   0xb   :  { %691 = vmatprep.subr.bf16.mxu0 %v917_v26  ;;  %723 = vmatprep.subr.bf16.mxu1 %v917_v26  ;;  %v951_v38 = vpack.c.bf16 %v48_v35, %v47_v34  ;;  %v965_v41 = vpack.c.bf16 %v50_v40, %v49_v39  ;;  %v51_v43 = vld [vmem:[%s1020_s1 + $0x70] sm:$0xff]  ;;  %v52_v44 = vld [vmem:[%s1020_s1 + $0x78] sm:$0xff]  ;;  %v36_v47 = vand.u32 127, %v35_v46  ;;  %s856_s1 = smov 32   ;;  %vm428_vm13 = vcmask 523264   ;;  %s441_s23 = sshll.u32 %s859_s22, 4  ;;  %s442_s23 = int_to_ptr.vmem [resolvable:$true] %s441_s23 }
   0xc   :  { %141 = vperm.xlu1 %822, %v33_v27   ;;  %54 = vperm.xlu0 %821, %v33_v27   ;;  %v710_v45 = vpack.c.bf16 %v52_v44, %v51_v43  ;;  %vm431_vm14 = vcmask 785408   ;;  %s827_s24 = scalar_lea.vmem %s442_s23, 256  ;;  %p832_p1 = scmp.lt.s32.totalorder %s442_s23, %s442_s23 }
   0xd   :  { %p828_p0 = scmp.ne.s32.totalorder %s442_s23, %s827_s24  ;;  %p833_p2 = scmp.lt.s32.totalorder %s827_s24, %s827_s24 }
   0xe   :  { %693 = vmatpush3.bf16.msra.mxu0 %v917_v26  ;;  %725 = vmatpush3.bf16.msra.mxu1 %v917_v26 }
   0xf   :  { %695 = vmatprep.subr.bf16.mxu0 %v929_v31  ;;  %727 = vmatprep.subr.bf16.mxu1 %v929_v31  ;;  %p834_p3 = por %p833_p2, %p832_p1 }
  0x10   :  { %144 = vperm.xlu1 %822, %v34_v30   ;;  %57 = vperm.xlu0 %821, %v34_v30  }
  0x11   :  { %p835_p4 = pnand %p834_p3, %p828_p0 }
  0x12   :  { %697 = vmatpush3.bf16.msra.mxu0 %v929_v31  ;;  %729 = vmatpush3.bf16.msra.mxu1 %v929_v31 }
  0x13   :  { %699 = vmatprep.subr.bf16.mxu0 %v947_v36  ;;  %731 = vmatprep.subr.bf16.mxu1 %v947_v36 }
  0x14   :  { %824 = vset.pattern.permute.xlu1 %v853_v37  ;;  %823 = vset.pattern.permute.xlu0 %v853_v37 }
  0x15   :  { %231 = vperm.xlu1 %824, %v34_v30   ;;  %228 = vperm.xlu0 %823, %v33_v27  }
  0x16   :  { %701 = vmatpush3.bf16.msra.mxu0 %v947_v36  ;;  %733 = vmatpush3.bf16.msra.mxu1 %v947_v36 }
  0x17   :  { %703 = vmatprep.subr.bf16.mxu0 %v951_v38  ;;  %735 = vmatprep.subr.bf16.mxu1 %v951_v38 }
  0x19   :  { %825 = vset.pattern.permute.xlu1 %v854_v42  ;;  %826 = vset.pattern.permute.xlu0 %v854_v42 }
  0x1a   :  { %315 = vperm.xlu1 %825, %v33_v27   ;;  %318 = vperm.xlu0 %826, %v34_v30  }
  0x1b   :  { %705 = vmatpush3.bf16.msra.mxu0 %v951_v38  ;;  %737 = vmatpush3.bf16.msra.mxu1 %v951_v38 }
  0x1c   :  { %707 = vmatprep.subr.bf16.mxu0 %v965_v41  ;;  %739 = vmatprep.subr.bf16.mxu1 %v965_v41 }
  0x1f   :  { %709 = vmatpush3.bf16.msra.mxu0 %v965_v41  ;;  %741 = vmatpush3.bf16.msra.mxu1 %v965_v41 }
  0x20   :  { %711 = vmatprep.subr.bf16.mxu0 %v710_v45  ;;  %743 = vmatprep.subr.bf16.mxu1 %v710_v45 }
  0x23   :  { %713 = vmatpush3.bf16.msra.mxu0 %v710_v45  ;;  %745 = vmatpush3.bf16.msra.mxu1 %v710_v45 }
  0x24   :  { %747 = vmatprep.subr.bf16.mxu0 %v901_v14  ;;  %779 = vmatprep.subr.bf16.mxu1 %v901_v14 }
  0x8b   :  { %v142_v48 = vpop.permute.xlu1 %141  ;;  %v55_v49 = vpop.permute.xlu0 %54 }
  0x8c   :  { %vm59_vm4 = vcmp.eq.s32.totalorder %v36_v47, %v55_v49  ;;  %vm146_vm5 = vcmp.eq.s32.totalorder %v36_v47, %v142_v48 }
  0x8d   :  { %574 = vmatprep.mubr.msk.f32.mxu0 %vm59_vm4, %v855_v50  ;;  %609 = vmatprep.mubr.msk.f32.mxu1 %vm146_vm5, %v855_v50 }
  0x8f   :  { %v145_v51 = vpop.permute.xlu1 %144  ;;  %v58_v52 = vpop.permute.xlu0 %57 }
  0x90   :  { %vm147_vm6 = vcmp.eq.s32.totalorder %v36_v47, %v145_v51  ;;  %vm60_vm7 = vcmp.eq.s32.totalorder %v36_v47, %v58_v52 }
  0x91   :  { %575 = vmatmul.mubr.msk.f32.vlgmr.msra.gmra.mrb[0].mxu0 %vm60_vm7, %v855_v50  ;;  %610 = vmatmul.mubr.msk.f32.vlgmr.msra.gmra.mrb[0].mxu1 %vm147_vm6, %v855_v50 }
  0x92   :  { %749 = vmatpush3.bf16.msra.mxu0 %v901_v14  ;;  %781 = vmatpush3.bf16.msra.mxu1 %v901_v14 }
  0x93   :  { %751 = vmatprep.subr.bf16.mxu0 %v903_v17  ;;  %783 = vmatprep.subr.bf16.mxu1 %v903_v17 }
  0x94   :  { %v232_v53 = vpop.permute.xlu1 %231  ;;  %v229_v54 = vpop.permute.xlu0 %228 }
  0x95   :  { %vm233_vm8 = vcmp.eq.s32.totalorder %v36_v47, %v229_v54  ;;  %vm234_vm11 = vcmp.eq.s32.totalorder %v36_v47, %v232_v53 }
  0x96   :  { %753 = vmatpush3.bf16.msra.mxu0 %v903_v17  ;;  %785 = vmatpush3.bf16.msra.mxu1 %v903_v17 }
  0x97   :  { %755 = vmatprep.subr.bf16.mxu0 %v917_v26  ;;  %787 = vmatprep.subr.bf16.mxu1 %v917_v26 }
  0x98   :  { %644 = vmatprep.mubr.msk.f32.mxu0 %vm233_vm8, %v855_v50 }
  0x99   :  { %v316_v55 = vpop.permute.xlu1 %315  ;;  %v319_v56 = vpop.permute.xlu0 %318 }
  0x9a   :  { %757 = vmatpush3.bf16.msra.mxu0 %v917_v26  ;;  %789 = vmatpush3.bf16.msra.mxu1 %v917_v26  ;;  %vm320_vm9 = vcmp.eq.s32.totalorder %v36_v47, %v316_v55  ;;  %vm321_vm10 = vcmp.eq.s32.totalorder %v36_v47, %v319_v56 }
  0x9b   :  { %759 = vmatprep.subr.bf16.mxu0 %v929_v31  ;;  %791 = vmatprep.subr.bf16.mxu1 %v929_v31 }
  0x9c   :  { %679 = vmatprep.mubr.msk.f32.mxu1 %vm320_vm9, %v855_v50 }
  0x9e   :  { %761 = vmatpush3.bf16.msra.mxu0 %v929_v31  ;;  %793 = vmatpush3.bf16.msra.mxu1 %v929_v31 }
  0x9f   :  { %763 = vmatprep.subr.bf16.mxu0 %v947_v36  ;;  %795 = vmatprep.subr.bf16.mxu1 %v947_v36 }
  0xa2   :  { %765 = vmatpush3.bf16.msra.mxu0 %v947_v36  ;;  %797 = vmatpush3.bf16.msra.mxu1 %v947_v36 }
  0xa3   :  { %767 = vmatprep.subr.bf16.mxu0 %v951_v38  ;;  %799 = vmatprep.subr.bf16.mxu1 %v951_v38 }
  0xa6   :  { %769 = vmatpush3.bf16.msra.mxu0 %v951_v38  ;;  %801 = vmatpush3.bf16.msra.mxu1 %v951_v38 }
  0xa7   :  { %771 = vmatprep.subr.bf16.mxu0 %v965_v41  ;;  %803 = vmatprep.subr.bf16.mxu1 %v965_v41 }
  0xaa   :  { %773 = vmatpush3.bf16.msra.mxu0 %v965_v41  ;;  %805 = vmatpush3.bf16.msra.mxu1 %v965_v41 }
  0xab   :  { %775 = vmatprep.subr.bf16.mxu0 %v710_v45  ;;  %807 = vmatprep.subr.bf16.mxu1 %v710_v45 }
  0xae   :  { %777 = vmatpush3.bf16.msra.mxu0 %v710_v45  ;;  %809 = vmatpush3.bf16.msra.mxu1 %v710_v45 }
  0xb1   :  { %645 = vmatmul.mubr.msk.f32.vlgmr.msra.gmra.mrb[2].mxu0 %vm234_vm11, %v855_v50  ;;  %680 = vmatmul.mubr.msk.f32.vlgmr.msra.gmra.mrb[2].mxu1 %vm321_vm10, %v855_v50 }
 0x164   :  { %v576_v57 = vpop.f32.mrb[0].mxu0  ;;  %v611_v58 = vpop.f32.mrb[0].mxu1 }
 0x165   :  { %405 = vrot.lane.b32.xlu1 %v611_v58, %s856_s1  ;;  %v131_v59 = vpop.f32.mrb[1].mxu0  ;;  %v218_v60 = vpop.f32.mrb[1].mxu1 }
 0x169   :  { %403 = vrot.lane.b32.xlu1 %v218_v60, %s856_s1 }
 0x184   :  { %v646_v61 = vpop.f32.mrb[2].mxu0  ;;  %v681_v62 = vpop.f32.mrb[2].mxu1 }
 0x185   :  { %413 = vrot.lane.b32.xlu1 %v646_v61, %s857_s20  ;;  %v305_v63 = vpop.f32.mrb[3].mxu0  ;;  %v392_v0 = vpop.f32.mrb[3].mxu1 }
 0x186   :  { %411 = vrot.lane.b32.xlu0 %v305_v63, %s857_s20 }
 0x189   :  { %421 = vrot.lane.b32.xlu1 %v681_v62, %s858_s21 }
 0x18a   :  { %419 = vrot.lane.b32.xlu0 %v392_v0, %s858_s21 }
 0x1d7   :  { %v406_v1 = vpop.permute.xlu1 %405 }
 0x1d8   :  { %v427_v5 = vsel %vm425_vm12, %v576_v57, %v406_v1 }
 0x1db   :  { %v404_v2 = vpop.permute.xlu1 %403 }
 0x1dc   :  { %v426_v6 = vsel %vm425_vm12, %v131_v59, %v404_v2 }
 0x1f7   :  { %v414_v3 = vpop.permute.xlu1 %413 }
 0x1f8   :  { %v412_v4 = vpop.permute.xlu0 %411  ;;  %v430_v7 = vsel %vm428_vm13, %v427_v5, %v414_v3 }
 0x1f9   :  { %v429_v9 = vsel %vm428_vm13, %v426_v6, %v412_v4 }
 0x1fb   :  { %v422_v8 = vpop.permute.xlu1 %421 }
 0x1fc   :  { %v433_v10 = vsel %vm431_vm14, %v430_v7, %v422_v8  ;;  %v420_v11 = vpop.permute.xlu0 %419 }
 0x1fd   :  { %435 = vst [vmem:[#allocation2 + $0x8] sm:$0xff] %v433_v10  ;;  %v432_v12 = vsel %vm431_vm14, %v429_v9, %v420_v11 }
 0x1fe   :  { %434 = vst [vmem:[#allocation2] sm:$0xff] %v432_v12 }
 0x1ff   :  { %838 = shalt.err (!%p835_p4)
}
 0x200   :  { %s839_s26 = scalar_lea.hbm %s1021_s2, 256 }
 0x201   :  { %p840_p5 = scmp.ne.s32.totalorder %s1021_s2, %s839_s26  ;;  %p843_p6 = scmp.lt.u32.totalorder %s839_s26, %s1021_s2 }
 0x203   :  { %p845_p7 = pnand %p843_p6, %p840_p5 }
 0x205   :  { %848 = shalt.err (!%p845_p7)
}
 0x206   :  { %s860_s3 = smov 128   ;;  %s861_s4 = smov 8  }
 0x207   :  { %447 = dma.vmem_to_hbm [thread:$0]  %s442_s23, 256, %s1021_s2, [#allocation3], %s860_s3, %s860_s3, %s861_s4  }
 0x208   :  { %849 = dma.done.wait [#allocation3], 256  }
 0x209   :  { %850 = vsyncadd [#allocation3], 4294967040 }
 0x20a   :  { %451 = vsyncpa [#allocation3], 1 }

</bundles_post_ra>
